<compile_context>
chip_gen: v6e
topology: v6e:2x2x1
jax: 0.10.0
libtpu: 0.0.40
codegen_flags: <defaults>
</compile_context>

<pallas_src>
import math

import jax
import jax.numpy as jnp
import numpy as np
from jax.experimental import pallas as pl
from jax.experimental.pallas import tpu as pltpu

# ----- constant selector matrices from DHT_Transform.__init__ (fixed, not learned)
THETA_COS   = np.array([[1, 0, 0, 0], [0, 1, 0, 0], [0, 0, 0, 0], [0, 0, 0, 0]], np.float64)
THETA_SIN   = np.array([[0, -1, 0, 0], [1, 0, 0, 0], [0, 0, 0, 0], [0, 0, 0, 0]], np.float64)
THETA_CONST = np.array([[0, 0, 0, 0], [0, 0, 0, 0], [0, 0, 1, 0], [0, 0, 0, 1]], np.float64)
D_SEL       = np.array([[0, 0, 0, 0], [0, 0, 0, 0], [0, 0, 0, 1], [0, 0, 0, 0]], np.float64)
A_SEL       = np.array([[0, 0, 0, 1], [0, 0, 0, 0], [0, 0, 0, 0], [0, 0, 0, 0]], np.float64)
ALPHA_COS   = np.array([[0, 0, 0, 0], [0, 1, 0, 0], [0, 0, 1, 0], [0, 0, 0, 0]], np.float64)
ALPHA_SIN   = np.array([[0, 0, 0, 0], [0, 0, -1, 0], [0, 1, 0, 0], [0, 0, 0, 0]], np.float64)
ALPHA_CONST = np.array([[1, 0, 0, 0], [0, 0, 0, 0], [0, 0, 0, 0], [0, 0, 0, 1]], np.float64)
EYE4        = np.eye(4, dtype=np.float64)

# TODO(synk): upscale_dim=True branch (per-DOF 1->10->...->1 tanh MLP) not implemented;
# this kernel covers the default upscale_dim=False path.


def _round_up(x, m):
    return ((x + m - 1) // m) * m


def _dh_coefficients(theta, a, alpha, proximal):
    """Host-side collapse of the fixed part of the DH chain.

    proximal=False: T_theta @ T_d @ T_a @ T_alpha = C0 + d*C1
    proximal=True : T_alpha @ T_a @ T_theta @ T_d = C0 + d*C1
    (T_d = I + d*D_SEL is linear in d; everything else is a fixed constant.)
    theta/a/alpha must be concrete Python scalars (fixed module parameters).
    """
    ct, st = math.cos(float(theta)), math.sin(float(theta))
    ca, sa = math.cos(float(alpha)), math.sin(float(alpha))
    T_theta = THETA_COS * ct + THETA_SIN * st + THETA_CONST
    T_alpha = ALPHA_COS * ca + ALPHA_SIN * sa + ALPHA_CONST
    T_a = A_SEL * float(a) + EYE4
    if proximal:
        base = T_alpha @ T_a @ T_theta
        c0, c1 = base, base @ D_SEL
    else:
        c0 = T_theta @ T_a @ T_alpha
        c1 = T_theta @ D_SEL @ T_a @ T_alpha
    # flatten row-major to (16, 1) columns so they broadcast against (1, B) d
    return (np.asarray(c0, np.float32).reshape(16, 1),
            np.asarray(c1, np.float32).reshape(16, 1))


def _dht_kernel(c0_ref, c1_ref, x_ref, out_ref):
    # c0_ref, c1_ref: VMEM (16, 1) constant columns (same block every step)
    # x_ref:          VMEM (1, TILE_B) "d" DOF per batch element (lane-dense)
    # out_ref:        VMEM (16, TILE_B) flattened 4x4 DH matrix per batch element
    d = x_ref[...]                                           # (1, TILE_B)
    out = c0_ref[...] + c1_ref[...] * d                      # f32 broadcast FMA
    out_ref[...] = out.astype(out_ref.dtype)                 # single unmasked full-tile store


def _choose_tile(b128, max_tile_b):
    # Aim for >= 4 grid steps (>= 2 per TensorCore on v7x) when the batch is
    # large enough, but never below 512 lanes per tile (per-step ~0.35us
    # overhead) and never above max_tile_b (double-buffered VMEM footprint).
    quarter = _round_up(-(-b128 // 4), 128)
    tile_b = min(max_tile_b, max(512, quarter))
    tile_b = min(tile_b, b128)            # tiny batches: one full tile
    return tile_b


def dht_transform(x, theta, a, alpha, proximal=False, *,
                  max_tile_b=65536, flat_output=False, out_dtype=jnp.float32):
    """x: (B, 1) float32 of the free DOF (d).

    Returns (B, 4, 4) by default (module contract).  With flat_output=True
    returns the lane-dense (16, B) slab (row r = flattened entry (r//4, r%4)),
    skipping the post-kernel transpose and halving end-to-end HBM traffic.
    """
    B = x.shape[0]
    c0, c1 = _dh_coefficients(theta, a, alpha, proximal)

    b128 = _round_up(B, 128)
    tile_b = _choose_tile(b128, int(max_tile_b))
    b_pad = _round_up(b128, tile_b)

    # Input plumbing: contract any trailing feature axes exactly like the
    # module's einsum ('xy,bz->bxy' sums over z), then lay d out lane-dense.
    xv = jnp.asarray(x, jnp.float32).reshape(B, -1)
    x2d = xv.sum(axis=1).reshape(1, B)
    if b_pad != B:
        x2d = jnp.pad(x2d, ((0, 0), (0, b_pad - B)))

    # Scoped-VMEM budget: double-buffered output + input + constants, with margin.
    vmem_limit = max(32 << 20, 2 * (16 + 1) * tile_b * 4 + (4 << 20))

    out_flat = pl.pallas_call(
        _dht_kernel,
        out_shape=jax.ShapeDtypeStruct((16, b_pad), out_dtype),
        grid=(b_pad // tile_b,),
        in_specs=[
            pl.BlockSpec((16, 1), lambda i: (0, 0)),        # C0 (constant, resident)
            pl.BlockSpec((16, 1), lambda i: (0, 0)),        # C1 (constant, resident)
            pl.BlockSpec((1, tile_b), lambda i: (0, i)),    # d per batch element
        ],
        out_specs=pl.BlockSpec((16, tile_b), lambda i: (0, i)),
        compiler_params=pltpu.CompilerParams(
            dimension_semantics=("parallel",),              # megacore split on v7x
            vmem_limit_bytes=int(vmem_limit)),
    )(jnp.asarray(c0), jnp.asarray(c1), x2d)

    if flat_output:
        # Lane-dense fast path: no transpose, no extra HBM pass.
        return out_flat if b_pad == B else out_flat[:, :B]

    # Module contract (B, 4, 4).  NOTE: this transpose is a standalone XLA copy
    # that re-reads/re-writes the full output; prefer flat_output=True (or fuse
    # the layout change into the consumer) when the (16, B) layout is acceptable.
    return out_flat.reshape(4, 4, b_pad)[:, :, :B].transpose(2, 0, 1)


# ----- pure-JAX reference (mirrors the PyTorch forward exactly) -----
def dht_reference(x, theta, a, alpha, proximal=False):
    B = x.shape[0]
    x2 = jnp.asarray(x, jnp.float32).reshape(B, -1)
    th = jnp.full((B, 1), theta, jnp.float32)
    av = jnp.full((B, 1), a, jnp.float32)
    al = jnp.full((B, 1), alpha, jnp.float32)

    def C(m):
        return jnp.asarray(m, jnp.float32)

    T_theta = (jnp.einsum('xy,bz->bxy', C(THETA_COS), jnp.cos(th))
               + jnp.einsum('xy,bz->bxy', C(THETA_SIN), jnp.sin(th))
               + C(THETA_CONST))
    T_d = jnp.einsum('xy,bz->bxy', C(D_SEL), x2) + C(EYE4)
    T_a = jnp.einsum('xy,bz->bxy', C(A_SEL), av) + C(EYE4)
    T_alpha = (jnp.einsum('xy,bz->bxy', C(ALPHA_COS), jnp.cos(al))
               + jnp.einsum('xy,bz->bxy', C(ALPHA_SIN), jnp.sin(al))
               + C(ALPHA_CONST))
    if proximal:
        return jnp.einsum('bij,bjk,bkl,blm->bim', T_alpha, T_a, T_theta, T_d)
    return jnp.einsum('bij,bjk,bkl,blm->bim', T_theta, T_d, T_a, T_alpha)


if __name__ == "__main__":
    # deterministic module parameters (theta fixed, d is the free DOF from x)
    THETA, A, ALPHA = 0.5, 0.25, 0.1
    B = 8

    key = jax.random.PRNGKey(0)
    x = jax.random.normal(key, (B, 1), dtype=jnp.float32)   # the "d" DOF input

    ok = True
    for proximal in (False, True):
        ref = dht_reference(x, THETA, A, ALPHA, proximal=proximal)

        # default path: module contract (B, 4, 4), f32
        out = jax.block_until_ready(dht_transform(x, THETA, A, ALPHA, proximal=proximal))
        ok &= out.shape == (B, 4, 4)
        ok &= np.allclose(np.asarray(out), np.asarray(ref), atol=1e-5, rtol=1e-5)

        # lane-dense fast path: (16, B) slab, no post-kernel transpose
        flat = jax.block_until_ready(
            dht_transform(x, THETA, A, ALPHA, proximal=proximal, flat_output=True))
        ok &= flat.shape == (16, B)
        ref_flat = np.asarray(ref).transpose(1, 2, 0).reshape(16, B)
        ok &= np.allclose(np.asarray(flat), ref_flat, atol=1e-5, rtol=1e-5)

    # bf16-output path (halves the dominant HBM write traffic), loose tolerance
    ref = dht_reference(x, THETA, A, ALPHA, proximal=False)
    out_bf16 = jax.block_until_ready(
        dht_transform(x, THETA, A, ALPHA, proximal=False, out_dtype=jnp.bfloat16))
    ok &= out_bf16.dtype == jnp.bfloat16
    ok &= np.allclose(np.asarray(out_bf16, np.float32), np.asarray(ref),
                      atol=2e-2, rtol=2e-2)

    assert ok
    print("KERNEL_OK")
</pallas_src>

<mosaic_0001>
module attributes {stable_mosaic.version = 11 : i64} {
  func.func @_dht_kernel(%arg0: i32, %arg1: memref<16x1xf32, #tpu.memory_space<vmem>>, %arg2: memref<16x1xf32, #tpu.memory_space<vmem>>, %arg3: memref<1x128xf32, #tpu.memory_space<vmem>>, %arg4: memref<16x128xf32, #tpu.memory_space<vmem>>) attributes {dimension_semantics = [#tpu.dimension_semantics<parallel>], iteration_bounds = array<i64: 1>, scalar_prefetch = 0 : i64, scratch_operands = 0 : i64, tpu.core_type = #tpu.core_type<tc>, window_params = [{pipeline_mode = #tpu.pipeline_mode<synchronous>, transform_indices = @transform_0, window_bounds = array<i64: 16, 1>}, {pipeline_mode = #tpu.pipeline_mode<synchronous>, transform_indices = @transform_1, window_bounds = array<i64: 16, 1>}, {transform_indices = @transform_2, window_bounds = array<i64: 1, 128>}, {transform_indices = @transform_3, window_bounds = array<i64: 16, 128>}]} {
    %c0 = arith.constant 0 : index
    %c0_0 = arith.constant 0 : index
    %0 = vector.load %arg3[%c0, %c0_0] : memref<1x128xf32, #tpu.memory_space<vmem>>, vector<1x128xf32>
    %c0_1 = arith.constant 0 : index
    %c0_2 = arith.constant 0 : index
    %1 = vector.load %arg1[%c0_1, %c0_2] : memref<16x1xf32, #tpu.memory_space<vmem>>, vector<16x1xf32>
    %c0_3 = arith.constant 0 : index
    %c0_4 = arith.constant 0 : index
    %2 = vector.load %arg2[%c0_3, %c0_4] : memref<16x1xf32, #tpu.memory_space<vmem>>, vector<16x1xf32>
    %3 = vector.broadcast %2 : vector<16x1xf32> to vector<16x128xf32>
    %4 = vector.broadcast %0 : vector<1x128xf32> to vector<16x128xf32>
    %5 = arith.mulf %3, %4 : vector<16x128xf32>
    %6 = vector.broadcast %1 : vector<16x1xf32> to vector<16x128xf32>
    %7 = arith.addf %6, %5 : vector<16x128xf32>
    %c0_5 = arith.constant 0 : index
    %c0_6 = arith.constant 0 : index
    %8 = vector.load %arg4[%c0_5, %c0_6] : memref<16x128xf32, #tpu.memory_space<vmem>>, vector<16x128xf32>
    tpu.vector_store %arg4[%c0_5, %c0_6], %7 {strides = array<i32>} : memref<16x128xf32, #tpu.memory_space<vmem>>, vector<16x128xf32>,
    return
  }
  func.func @transform_0(%arg0: i32) -> (i32, i32) {
    %c0_i32 = arith.constant 0 : i32
    %c0_i32_0 = arith.constant 0 : i32
    %c0_i32_1 = arith.constant 0 : i32
    return %c0_i32, %c0_i32_0 : i32, i32
  }
  func.func @transform_1(%arg0: i32) -> (i32, i32) {
    %c0_i32 = arith.constant 0 : i32
    %c0_i32_0 = arith.constant 0 : i32
    %c0_i32_1 = arith.constant 0 : i32
    return %c0_i32, %c0_i32_0 : i32, i32
  }
  func.func @transform_2(%arg0: i32) -> (i32, i32) {
    %c0_i32 = arith.constant 0 : i32
    %c0_i32_0 = arith.constant 0 : i32
    return %c0_i32, %arg0 : i32, i32
  }
  func.func @transform_3(%arg0: i32) -> (i32, i32) {
    %c0_i32 = arith.constant 0 : i32
    %c0_i32_0 = arith.constant 0 : i32
    return %c0_i32, %arg0 : i32, i32
  }
}

</mosaic_0001>

<bundles_post_ra>
// kernel: tpu_custom_call.1
= control target key start
LH: loop header
LB: loop body
LE: loop exit
PB: predicated region body
PF: predicated region fallthrough
CT: control target
= control target key end

     0   :  { %v97_v2 = vmov 0   ;;  %s139_s0 = inlined_call_operand.vmem [shape: f32[16,1], index: 0, kind: input, shape index: {}]   ;;  %s140_s1 = inlined_call_operand.vmem [shape: f32[16,1], index: 1, kind: input, shape index: {}]   ;;  %s141_s2 = inlined_call_operand.vmem [shape: f32[1,128], index: 2, kind: input, shape index: {}]   ;;  %s142_s3 = inlined_call_operand.hbm [shape: f32[16,128], index: 3, kind: output, shape index: {}]  }
   0x1   :  { %v18_v0 = vld [vmem:[%s140_s1] sm:$0xff]  ;;  %74 = vset.pattern.permute.xlu1 %v97_v2  ;;  %73 = vset.pattern.permute.xlu0 %v97_v2 }
   0x2   :  { %v16_v1 = vld [vmem:[%s139_s0] sm:$0xff] }
   0x3   :  { %8 = vsyncpa [#allocation3], 0  ;;  %22 = vperm.xlu0 %73, %v18_v0   ;;  %40 = vperm.xlu1 %74, %v16_v1   ;;  %v19_v3 = vld [vmem:[%s140_s1 + $0x8] sm:$0xff]  ;;  %v68_v5 = vld [vmem:[%s141_s2] ss:$0 sm:$0xff]  ;;  %s98_s22 = smov [#allocation2]  }
   0x4   :  { %v17_v4 = vld [vmem:[%s139_s0 + $0x8] sm:$0xff]  ;;  %s57_s23 = sshll.u32 %s98_s22, 4  ;;  %s58_s23 = int_to_ptr.vmem [resolvable:$true] %s57_s23 }
   0x5   :  { %s75_s0 = scalar_lea.vmem %s58_s23, 256  ;;  %p80_p1 = scmp.lt.s32.totalorder %s58_s23, %s58_s23 }
   0x6   :  { %p76_p0 = scmp.ne.s32.totalorder %s58_s23, %s75_s0  ;;  %p81_p2 = scmp.lt.s32.totalorder %s75_s0, %s75_s0 }
   0x7   :  { %27 = vperm.xlu0 %73, %v19_v3   ;;  %45 = vperm.xlu1 %74, %v17_v4  }
   0x8   :  { %p82_p3 = por %p81_p2, %p80_p1 }
   0xa   :  { %p83_p4 = pnand %p82_p3, %p76_p0 }
  0x7e   :  { %v23_v6 = vpop.permute.xlu0 %22  ;;  %v41_v7 = vpop.permute.xlu1 %40 }
  0x7f   :  { %v36_v8 = vmul.f32 %v68_v5, %v23_v6 }
  0x81   :  { %v48_v9 = vadd.f32 %v41_v7, %v36_v8 }
  0x82   :  { %v28_v10 = vpop.permute.xlu0 %27  ;;  %v46_v12 = vpop.permute.xlu1 %45 }
  0x83   :  { %50 = vst [vmem:[#allocation2] sm:$0xff] %v48_v9  ;;  %v37_v11 = vmul.f32 %v68_v5, %v28_v10 }
  0x85   :  { %v49_v13 = vadd.f32 %v46_v12, %v37_v11 }
  0x87   :  { %51 = vst [vmem:[#allocation2 + $0x8] sm:$0xff] %v49_v13 }
  0x88   :  { %86 = shalt.err (!%p83_p4)
}
  0x89   :  { %s99_s1 = smov 128   ;;  %s100_s2 = smov 8  }
  0x8a   :  { %63 = dma.vmem_to_hbm [thread:$0]  %s58_s23, 256, %s142_s3, [#allocation3], %s99_s1, %s99_s1, %s100_s2  }
  0x8b   :  { %95 = dma.done.wait [#allocation3], 256  }
  0x8c   :  { %96 = vsyncadd [#allocation3], 4294967040 }
  0x8d   :  { %67 = vsyncpa [#allocation3], 1 }

</bundles_post_ra>
